<compile_context>
chip_gen: v7x
topology: tpu7x:2x2x1
jax: 0.10.0
libtpu: 0.0.40
codegen_flags: <defaults>
</compile_context>

<pallas_src>
import functools

import jax
import jax.numpy as jnp
from jax import lax
from jax.experimental import pallas as pl
from jax.experimental.pallas import tpu as pltpu

_LANE = 128            # TPU lane width (last dim of every tile)
_SUBLANE = 8           # sublane granularity
_MAX_TILE_ROWS = 8192  # 8192 x 128 f32 = 4 MiB / input block; 3 inputs x 2 bufs = 24 MiB


# ----------------------------------------------------------------------------
# Fused kernel: hinge + running reduction into the resident output block
# ----------------------------------------------------------------------------
def _pairwise_loss_kernel(margin_ref, pos_ref, neg_ref, mask_ref, out_ref, *,
                          acc_rows, tile_rows, total_rows, steps_per_part,
                          needs_tail_mask):
    """out_ref: (1, acc_rows, 128) f32 per-parallel-slice partial sums."""
    i = pl.program_id(1)                     # inner ("arbitrary") streaming axis

    @pl.when(i == 0)
    def _():
        out_ref[...] = jnp.zeros_like(out_ref)

    pos = pos_ref[...].astype(jnp.float32)   # (tile_rows, 128)
    neg = neg_ref[...].astype(jnp.float32)
    mask = mask_ref[...].astype(jnp.float32)
    margin = margin_ref[0, 0]                # SMEM scalar

    # (neg - pos) * mask == neg*mask - pos*mask for the 0/1 masks this loss uses,
    # and saves one vmul per element.
    subtract = (neg - pos) * mask
    margin_term = jnp.where(mask != 0.0, margin, jnp.float32(0.0))
    hinge = jnp.maximum(margin_term + subtract, jnp.float32(0.0))

    if needs_tail_mask:
        # Zero rows beyond the true row count (ragged last block and/or the
        # clamped excess block of an uneven parallel split).
        p = pl.program_id(0)
        gb = p * steps_per_part + i                      # global block index
        limit = total_rows - gb * tile_rows              # valid rows in this block
        row_idx = lax.broadcasted_iota(jnp.int32, hinge.shape, 0)
        hinge = jnp.where(row_idx < limit, hinge, jnp.float32(0.0))

    if acc_rows == _SUBLANE:
        # Fold vreg-by-vreg (pure VPU adds); sublane collapse deferred to wrapper.
        part = hinge.reshape(-1, _SUBLANE, _LANE).sum(axis=0)      # (8, 128)
    else:
        part = jnp.sum(hinge, axis=0, keepdims=True)               # (1, 128)

    out_ref[...] += part[None, :, :]


# ----------------------------------------------------------------------------
# Wrapper
# ----------------------------------------------------------------------------
def adaptive_pairwise_loss(pos, neg, mask, *, margin, max_tile_rows=_MAX_TILE_ROWS):
    """Scalar mean(max(margin*(mask!=0) + neg*mask - pos*mask, 0))."""
    assert pos.shape == neg.shape == mask.shape
    n = int(pos.size)
    if mask.dtype != pos.dtype:              # no-op for the demo (all f32)
        mask = mask.astype(pos.dtype)

    # Flatten to a lane-dense (rows, 128) view.  Reshape of contiguous data is
    # free; the ONLY pad is the <128-element lane tail when n % 128 != 0 (the
    # padded elements contribute max(0, 0) = 0 exactly).
    pos_f, neg_f, mask_f = pos.reshape(-1), neg.reshape(-1), mask.reshape(-1)
    rows = pl.cdiv(n, _LANE)
    n_lane = rows * _LANE
    if n_lane != n:
        pad = (0, n_lane - n)
        pos_f, neg_f, mask_f = (jnp.pad(a, pad) for a in (pos_f, neg_f, mask_f))
    pos2 = pos_f.reshape(rows, _LANE)
    neg2 = neg_f.reshape(rows, _LANE)
    mask2 = mask_f.reshape(rows, _LANE)

    # Tile selection: one block if everything fits, else big 8-aligned tiles.
    tile_rows = rows if rows <= max_tile_rows else max_tile_rows
    num_blocks = pl.cdiv(rows, tile_rows)
    num_parallel = 2 if num_blocks >= 2 else 1        # v7x: one stream per TensorCore
    steps = pl.cdiv(num_blocks, num_parallel)
    acc_rows = _SUBLANE if tile_rows % _SUBLANE == 0 else 1
    needs_tail_mask = (num_parallel * steps * tile_rows) != rows

    last_block = num_blocks - 1

    def in_map(p, i):
        # Clamp excess (p, i) cells of an uneven split; their contribution is
        # zeroed by the in-kernel row mask.
        return (jnp.minimum(p * steps + i, last_block), 0)

    in_tile = pl.BlockSpec((tile_rows, _LANE), in_map)

    kernel = functools.partial(
        _pairwise_loss_kernel,
        acc_rows=acc_rows, tile_rows=tile_rows, total_rows=rows,
        steps_per_part=steps, needs_tail_mask=needs_tail_mask)

    itemsize = jnp.dtype(pos.dtype).itemsize
    block_bytes = tile_rows * _LANE * itemsize
    # 3 inputs x 2 pipeline buffers + slack; clamp so it fits v7x's 64 MiB VMEM.
    vmem_limit = int(min(max(3 * 2 * block_bytes + (4 << 20), 16 << 20), 48 << 20))

    cost = pl.CostEstimate(
        flops=7 * n, transcendentals=0,
        bytes_accessed=3 * n * itemsize + num_parallel * acc_rows * _LANE * 4)

    margin_arr = jnp.full((1, 1), margin, dtype=jnp.float32)

    partials = pl.pallas_call(
        kernel,
        out_shape=jax.ShapeDtypeStruct((num_parallel, acc_rows, _LANE), jnp.float32),
        grid=(num_parallel, steps),
        in_specs=[
            pl.BlockSpec(memory_space=pltpu.MemorySpace.SMEM),   # margin scalar
            in_tile, in_tile, in_tile,
        ],
        out_specs=pl.BlockSpec((1, acc_rows, _LANE), lambda p, i: (p, 0, 0)),
        compiler_params=pltpu.CompilerParams(
            dimension_semantics=("parallel", "arbitrary"),
            vmem_limit_bytes=vmem_limit,
        ),
        cost_estimate=cost,
    )(margin_arr, pos2, neg2, mask2)

    # Tiny final reduction + mean scale (negligible XLA op on a (P, 8, 128) array).
    return jnp.sum(partials) / n


# ----------------------------------------------------------------------------
# Pure-JAX reference (mirrors the PyTorch forward)
# ----------------------------------------------------------------------------
def _ref_loss(pos, neg, mask, margin):
    subtract = neg * mask - pos * mask
    margin_t = jnp.where(mask != 0.0, jnp.float32(margin), jnp.float32(0.0))
    return jnp.mean(jnp.maximum(margin_t + subtract, 0.0))


def _check(pos, neg, mask, margin, **kw):
    out = adaptive_pairwise_loss(pos, neg, mask, margin=margin, **kw)
    out = jax.block_until_ready(out)
    ref = _ref_loss(pos, neg, mask, margin)
    assert out.shape == (), out.shape
    assert jnp.allclose(out, ref, atol=1e-5, rtol=1e-5), (out, ref)


# ----------------------------------------------------------------------------
# Main
# ----------------------------------------------------------------------------
if __name__ == "__main__":
    # args.ranking_loss_margin = 1.0; pos/neg/mask are same-shape score tensors.
    key = jax.random.PRNGKey(0)

    # 1) Default path: (2, 8, 32) -> rows = 4, single block, single core.
    k1, k2, k3, key = jax.random.split(key, 4)
    B, S, H = 2, 8, 32
    pos = jax.random.normal(k1, (B, S, H), dtype=jnp.float32)
    neg = jax.random.normal(k2, (B, S, H), dtype=jnp.float32)
    mask = (jax.random.uniform(k3, (B, S, H)) < 0.7).astype(jnp.float32)
    _check(pos, neg, mask, margin=1.0)

    # 2) Multi-block + parallel split + ragged last block (small tiles to force it).
    k1, k2, k3, key = jax.random.split(key, 4)
    pos = jax.random.normal(k1, (2, 13, 64), dtype=jnp.float32)
    neg = jax.random.normal(k2, (2, 13, 64), dtype=jnp.float32)
    mask = (jax.random.uniform(k3, (2, 13, 64)) < 0.6).astype(jnp.float32)
    _check(pos, neg, mask, margin=0.5, max_tile_rows=8)

    # 3) n not divisible by 128 (lane-tail pad path).
    k1, k2, k3, key = jax.random.split(key, 4)
    pos = jax.random.normal(k1, (2, 3, 5), dtype=jnp.float32)
    neg = jax.random.normal(k2, (2, 3, 5), dtype=jnp.float32)
    mask = (jax.random.uniform(k3, (2, 3, 5)) < 0.7).astype(jnp.float32)
    _check(pos, neg, mask, margin=1.0)

    print("KERNEL_OK")
</pallas_src>

<mosaic_0001>
module attributes {stable_mosaic.version = 11 : i64} {
  func.func @_pairwise_loss_kernel(%arg0: i32, %arg1: i32, %arg2: memref<1x1xf32, #tpu.memory_space<smem>>, %arg3: memref<4x128xf32, #tpu.memory_space<vmem>>, %arg4: memref<4x128xf32, #tpu.memory_space<vmem>>, %arg5: memref<4x128xf32, #tpu.memory_space<vmem>>, %arg6: memref<1x1x128xf32, #tpu.memory_space<vmem>>) attributes {dimension_semantics = [#tpu.dimension_semantics<parallel>, #tpu.dimension_semantics<arbitrary>], iteration_bounds = array<i64: 1, 1>, scalar_prefetch = 0 : i64, scratch_operands = 0 : i64, tpu.core_type = #tpu.core_type<tc>, window_params = [{transform_indices = @transform_0, window_bounds = array<i64: 1, 1>}, {transform_indices = @transform_1, window_bounds = array<i64: 4, 128>}, {transform_indices = @transform_2, window_bounds = array<i64: 4, 128>}, {transform_indices = @transform_3, window_bounds = array<i64: 4, 128>}, {transform_indices = @transform_4, window_bounds = array<i64: 1, 1, 128>}]} {
    %c0_i32 = arith.constant 0 : i32
    %0 = arith.cmpi eq, %arg1, %c0_i32 : i32
    %1 = arith.extui %0 : i1 to i32
    %c0_i32_0 = arith.constant 0 : i32
    %2 = arith.cmpi ne, %1, %c0_i32_0 : i32
    scf.if %2 {
      %cst_17 = arith.constant 0.000000e+00 : f32
      %23 = vector.broadcast %cst_17 : f32 to vector<1x1x128xf32>
      %c0_18 = arith.constant 0 : index
      %c0_19 = arith.constant 0 : index
      %c0_20 = arith.constant 0 : index
      %24 = vector.load %arg6[%c0_18, %c0_19, %c0_20] : memref<1x1x128xf32, #tpu.memory_space<vmem>>, vector<1x1x128xf32>
      tpu.vector_store %arg6[%c0_18, %c0_19, %c0_20], %23 {strides = array<i32>} : memref<1x1x128xf32, #tpu.memory_space<vmem>>, vector<1x1x128xf32>,
    } else {
    }
    %c0 = arith.constant 0 : index
    %c0_1 = arith.constant 0 : index
    %3 = vector.load %arg3[%c0, %c0_1] : memref<4x128xf32, #tpu.memory_space<vmem>>, vector<4x128xf32>
    %c0_2 = arith.constant 0 : index
    %c0_3 = arith.constant 0 : index
    %4 = vector.load %arg4[%c0_2, %c0_3] : memref<4x128xf32, #tpu.memory_space<vmem>>, vector<4x128xf32>
    %c0_4 = arith.constant 0 : index
    %c0_5 = arith.constant 0 : index
    %5 = vector.load %arg5[%c0_4, %c0_5] : memref<4x128xf32, #tpu.memory_space<vmem>>, vector<4x128xf32>
    %c0_6 = arith.constant 0 : index
    %c0_7 = arith.constant 0 : index
    %6 = memref.load %arg2[%c0_6, %c0_7] : memref<1x1xf32, #tpu.memory_space<smem>>
    %7 = arith.subf %4, %3 : vector<4x128xf32>
    %8 = arith.mulf %7, %5 : vector<4x128xf32>
    %cst = arith.constant 0.000000e+00 : f32
    %9 = vector.broadcast %cst : f32 to vector<4x128xf32>
    %10 = arith.cmpf one, %5, %9 : vector<4x128xf32>
    %cst_8 = arith.constant 0.000000e+00 : f32
    %11 = vector.broadcast %6 : f32 to vector<4x128xf32>
    %12 = vector.broadcast %cst_8 : f32 to vector<4x128xf32>
    %13 = arith.select %10, %11, %12 : vector<4x128xi1>, vector<4x128xf32>
    %14 = arith.addf %13, %8 : vector<4x128xf32>
    %cst_9 = arith.constant 0.000000e+00 : f32
    %15 = vector.broadcast %cst_9 : f32 to vector<4x128xf32>
    %16 = arith.maximumf %14, %15 : vector<4x128xf32>
    %cst_10 = arith.constant dense<0.000000e+00> : vector<128xf32>
    %17 = vector.multi_reduction <add>, %16, %cst_10 [0] : vector<4x128xf32> to vector<128xf32>
    %18 = vector.shape_cast %17 : vector<128xf32> to vector<1x128xf32>
    %c0_11 = arith.constant 0 : index
    %c0_12 = arith.constant 0 : index
    %c0_13 = arith.constant 0 : index
    %19 = vector.load %arg6[%c0_11, %c0_12, %c0_13] : memref<1x1x128xf32, #tpu.memory_space<vmem>>, vector<1x1x128xf32>
    %20 = vector.shape_cast %18 : vector<1x128xf32> to vector<1x1x128xf32>
    %21 = arith.addf %19, %20 : vector<1x1x128xf32>
    %c0_14 = arith.constant 0 : index
    %c0_15 = arith.constant 0 : index
    %c0_16 = arith.constant 0 : index
    %22 = vector.load %arg6[%c0_14, %c0_15, %c0_16] : memref<1x1x128xf32, #tpu.memory_space<vmem>>, vector<1x1x128xf32>
    tpu.vector_store %arg6[%c0_14, %c0_15, %c0_16], %21 {strides = array<i32>} : memref<1x1x128xf32, #tpu.memory_space<vmem>>, vector<1x1x128xf32>,
    return
  }
  func.func @transform_0(%arg0: i32, %arg1: i32) -> (i32, i32) {
    %c0_i32 = arith.constant 0 : i32
    %c0_i32_0 = arith.constant 0 : i32
    %c0_i32_1 = arith.constant 0 : i32
    return %c0_i32, %c0_i32_0 : i32, i32
  }
  func.func @transform_1(%arg0: i32, %arg1: i32) -> (i32, i32) {
    %c1_i32 = arith.constant 1 : i32
    %0 = arith.muli %arg0, %c1_i32 : i32
    %1 = arith.addi %0, %arg1 : i32
    %c0_i32 = arith.constant 0 : i32
    %2 = arith.minsi %1, %c0_i32 : i32
    %c0_i32_0 = arith.constant 0 : i32
    %c0_i32_1 = arith.constant 0 : i32
    return %2, %c0_i32_0 : i32, i32
  }
  func.func @transform_2(%arg0: i32, %arg1: i32) -> (i32, i32) {
    %c1_i32 = arith.constant 1 : i32
    %0 = arith.muli %arg0, %c1_i32 : i32
    %1 = arith.addi %0, %arg1 : i32
    %c0_i32 = arith.constant 0 : i32
    %2 = arith.minsi %1, %c0_i32 : i32
    %c0_i32_0 = arith.constant 0 : i32
    %c0_i32_1 = arith.constant 0 : i32
    return %2, %c0_i32_0 : i32, i32
  }
  func.func @transform_3(%arg0: i32, %arg1: i32) -> (i32, i32) {
    %c1_i32 = arith.constant 1 : i32
    %0 = arith.muli %arg0, %c1_i32 : i32
    %1 = arith.addi %0, %arg1 : i32
    %c0_i32 = arith.constant 0 : i32
    %2 = arith.minsi %1, %c0_i32 : i32
    %c0_i32_0 = arith.constant 0 : i32
    %c0_i32_1 = arith.constant 0 : i32
    return %2, %c0_i32_0 : i32, i32
  }
  func.func @transform_4(%arg0: i32, %arg1: i32) -> (i32, i32, i32) {
    %c0_i32 = arith.constant 0 : i32
    %c0_i32_0 = arith.constant 0 : i32
    %c0_i32_1 = arith.constant 0 : i32
    return %arg0, %c0_i32, %c0_i32_0 : i32, i32, i32
  }
}

</mosaic_0001>

<bundles_post_ra>
// kernel: tpu_custom_call.1
= control target key start
LH: loop header
LB: loop body
LE: loop exit
PB: predicated region body
PF: predicated region fallthrough
CT: control target
= control target key end

     0   :  { %10 = vsyncpa [#allocation4], 0  ;;  %s261_s0 = inlined_call_operand.<no memory space> [shape: f32[1,1], index: 0, kind: input, shape index: {}]   ;;  %s262_s1 = inlined_call_operand.hbm [shape: f32[4,128], index: 1, kind: input, shape index: {}]   ;;  %s263_s2 = inlined_call_operand.vmem [shape: f32[4,128], index: 2, kind: input, shape index: {}]   ;;  %s264_s3 = inlined_call_operand.vmem [shape: f32[4,128], index: 3, kind: input, shape index: {}]   ;;  %s265_s4 = inlined_call_operand.hbm [shape: f32[1,1,128], index: 4, kind: output, shape index: {}]  }
   0x1   :  { %11 = vsyncpa [#allocation5], 0  ;;  %s200_s15 = smov [#allocation3]   ;;  %s152_s19 = scalar_lea.hbm %s262_s1, 64 }
   0x2   :  { %s25_s16 = sshll.u32 %s200_s15, 4  ;;  %p153_p0 = scmp.ne.s32.totalorder %s262_s1, %s152_s19  ;;  %s26_s16 = int_to_ptr.vmem [resolvable:$true] %s25_s16 }
   0x3   :  { %p156_p1 = scmp.lt.u32.totalorder %s152_s19, %s262_s1 }
   0x5   :  { %p158_p2 = pnand %p156_p1, %p153_p0 }
   0x7   :  { %161 = shalt.err (!%p158_p2)
}
   0x8   :  { %s162_s24 = scalar_lea.vmem %s26_s16, 64  ;;  %p167_p4 = scmp.lt.s32.totalorder %s26_s16, %s26_s16 }
   0x9   :  { %p163_p3 = scmp.ne.s32.totalorder %s26_s16, %s162_s24  ;;  %p168_p5 = scmp.lt.s32.totalorder %s162_s24, %s162_s24 }
   0xb   :  { %p169_p6 = por %p168_p5, %p167_p4 }
   0xd   :  { %p170_p7 = pnand %p169_p6, %p163_p3 }
   0xf   :  { %173 = shalt.err (!%p170_p7)
}
  0x10   :  { %28 = dma.hbm_to_vmem [thread:$0]  %s262_s1, 64, %s26_s16, [#allocation4]  }
  0x11   :  { %196 = dma.done.wait [#allocation4], 64  }
  0x12   :  { %197 = vsyncadd [#allocation4], 4294967232  ;;  %v201_v0 = vmov 0.0   ;;  %v105_v1 = vstv %s261_s0  ;;  %v98_v2 = vld [vmem:[#allocation3] sm:$0xf]  ;;  %vm109_vm1 = vcmask 1043456  }
  0x13   :  { %97 = vst [vmem:[#allocation6] sm:$0x1] %v201_v0  ;;  %v99_v3 = vld [vmem:[%s263_s2] sm:$0xf]  ;;  %s202_s0 = smov [#allocation6]  }
  0x14   :  { %v100_v4 = vld [vmem:[%s264_s3] sm:$0xf]  ;;  %v102_v5 = vsub.f32 %v99_v3, %v98_v2  ;;  %s126_s1 = sshll.u32 %s202_s0, 4  ;;  %s127_s1 = int_to_ptr.vmem [resolvable:$true] %s126_s1 }
  0x15   :  { %vm104_vm0 = vcmp.ne.f32.partialorder %v100_v4, 0.0  ;;  %s174_s2 = scalar_lea.vmem %s127_s1, 16  ;;  %s178_s3 = scalar_lea.vmem %s127_s1, 32 }
  0x16   :  { %v106_v6 = vsel %vm104_vm0, %v105_v1, 0.0  ;;  %v103_v7 = vmul.f32 %v102_v5, %v100_v4  ;;  %p175_p8 = scmp.ne.s32.totalorder %s127_s1, %s174_s2  ;;  %p179_p9 = scmp.lt.s32.totalorder %s127_s1, %s127_s1 }
  0x17   :  { %p180_p10 = scmp.lt.s32.totalorder %s178_s3, %s174_s2 }
  0x18   :  { %v107_v8 = vadd.f32 %v106_v6, %v103_v7 }
  0x19   :  { %p181_p11 = por %p180_p10, %p179_p9 }
  0x1a   :  { %v108_v9 = vmax.f32 %v107_v8, 0.0  ;;  %v117_v16 = vld [vmem:[#allocation6] sm:$0x1] }
  0x1b   :  { %p182_p12 = pnand %p181_p11, %p175_p8 }
  0x1c   :  { %v110_v10 = vsel %vm109_vm1, %v108_v9, 0.0 }
  0x1d   :  { %v111_v11 = vrot.slane %v110_v10, 4 }
  0x1f   :  { %v112_v12 = vadd.f32 %v111_v11, %v110_v10 }
  0x21   :  { %v113_v13 = vrot.slane %v112_v12, 2 }
  0x23   :  { %v114_v14 = vadd.f32 %v113_v13, %v112_v12 }
  0x25   :  { %v115_v15 = vrot.slane %v114_v14, 1 }
  0x27   :  { %v116_v17 = vadd.f32 %v115_v15, %v114_v14 }
  0x29   :  { %v118_v18 = vadd.f32 %v117_v16, %v116_v17 }
  0x2b   :  { %119 = vst [vmem:[#allocation6] sm:$0x1] %v118_v18 }
  0x2c   :  { %185 = shalt.err (!%p182_p12)
}
  0x2d   :  { %s186_s9 = scalar_lea.hbm %s265_s4, 16 }
  0x2e   :  { %p187_p13 = scmp.ne.s32.totalorder %s265_s4, %s186_s9  ;;  %p190_p0 = scmp.lt.u32.totalorder %s186_s9, %s265_s4 }
  0x30   :  { %p192_p1 = pnand %p190_p0, %p187_p13 }
  0x32   :  { %195 = shalt.err (!%p192_p1)
}
  0x33   :  { %129 = dma.vmem_to_hbm [thread:$0]  %s127_s1, 16, %s265_s4, [#allocation5]  }
  0x34   :  { %198 = dma.done.wait [#allocation5], 16  }
  0x35   :  { %199 = vsyncadd [#allocation5], 4294967280 }
  0x36   :  { %133 = vsyncpa [#allocation4], 1 }
  0x37   :  { %134 = vsyncpa [#allocation5], 1 }

</bundles_post_ra>
